<compile_context>
chip_gen: v6e
topology: v6e:2x2x1
jax: 0.10.0
libtpu: 0.0.40
codegen_flags: <defaults>
</compile_context>

<pallas_src>
import functools

import jax
import jax.numpy as jnp
from jax.experimental import pallas as pl
from jax.experimental.pallas import tpu as pltpu


# Slab layout (one (8, 128) f32 vreg):
#   row 0, lanes [0:H)    : w1  (hidden weights, F == 1)
#   row 1, lanes [0:H)    : b1  (hidden bias);  lane H = 1.0  (ones lane)
#   row 2, lanes [0:H)    : w2  (output weights, O == 1); lane H = b2
#   rows [3:3+B), lane 0  : x   (input batch, batch on sublanes)
_ROW_W1, _ROW_B1, _ROW_W2, _ROW_X0 = 0, 1, 2, 3


def mlp_kernel(params_ref, out_ref, *, B):
    """relu(x @ w1 + b1) @ w2 + b2, every operand unpacked from one vreg."""
    p = params_ref[...]                         # (8, 128): single vreg load
    w1 = p[_ROW_W1:_ROW_W1 + 1, :]              # (1, 128) lane-dense row
    b1 = p[_ROW_B1:_ROW_B1 + 1, :]              # (1, 128) (lane H carries 1.0)
    w2 = p[_ROW_W2:_ROW_W2 + 1, :]              # (1, 128) (lane H carries b2)
    x = p[_ROW_X0:_ROW_X0 + B, 0:1]             # (B, 1)   batch on sublanes

    # K == 1 layer: outer product -> VPU broadcast multiply (no MXU fill/drain).
    # Lanes >= H+1 are zero in both w1 and b1, so they stay zero through ReLU.
    h = jnp.maximum(x * w1 + b1, 0.0)           # (B, 128): one vreg
    # N == 1 layer: per-row reduction over lanes -> XLU reduction (no MXU).
    # Lane H contributes 1.0 * b2, i.e. the output bias is folded in here.
    y = jnp.sum(h * w2, axis=-1, keepdims=True)  # (B, 1)

    out_ref[...] = y.astype(out_ref.dtype)
    # TODO(synk): torch's register_hook (backward gradient hooks) and the
    # prints of intermediate activations have no Pallas forward-pass
    # equivalent; omitted.


def net_forward(x, w1, b1, w2, b2):
    """Forward pass of Net.

    x : (B, 1), w1 : (1, H), b1 : (1, H), w2 : (H, 1), b2 : (1, 1).
    Weights follow torch.nn.Linear pre-transposed to [in, out], so the math
    is relu(x @ w1 + b1) @ w2 + b2.  Output is (B, 1) directly.
    """
    B, F = x.shape
    H = w1.shape[1]
    O = w2.shape[1]
    assert F == 1 and O == 1, "kernel specialised to the module's F=1, O=1 use"
    assert H + 1 <= 128, "hidden width (+ ones lane) must fit in 128 lanes"
    assert _ROW_X0 + B <= 8, "batch must fit in the slab's x rows"

    # Wrapper-side packing: 5 tiny operands -> one (8, 128) slab -> one DMA.
    f32 = jnp.float32
    slab = jnp.zeros((8, 128), f32)
    slab = slab.at[_ROW_W1, :H].set(w1.reshape(H).astype(f32))
    slab = slab.at[_ROW_B1, :H].set(b1.reshape(H).astype(f32))
    slab = slab.at[_ROW_B1, H].set(1.0)                       # ones lane
    slab = slab.at[_ROW_W2, :H].set(w2.reshape(H).astype(f32))
    slab = slab.at[_ROW_W2, H].set(b2.reshape(()).astype(f32))  # b2 folded in
    slab = slab.at[_ROW_X0:_ROW_X0 + B, 0].set(x.reshape(B).astype(f32))

    cost = pl.CostEstimate(
        flops=2 * B * (F * H + H * O),
        transcendentals=0,
        bytes_accessed=4 * (8 * 128 + B * O),
    )

    vmem = pl.BlockSpec(memory_space=pltpu.MemorySpace.VMEM)
    return pl.pallas_call(
        functools.partial(mlp_kernel, B=B),
        out_shape=jax.ShapeDtypeStruct((B, O), x.dtype),
        in_specs=[vmem],
        out_specs=vmem,
        cost_estimate=cost,
    )(slab)


if __name__ == "__main__":
    # Matches the module's driver: x = unsqueeze(linspace(-1, 1, 5), dim=1)
    n_features, n_hidden, n_output = 1, 32, 1
    x = jnp.linspace(-1.0, 1.0, 5, dtype=jnp.float32)[:, None]   # (5, 1)

    # Deterministic parameter init (synthetic; shapes from Net.__init__).
    key = jax.random.PRNGKey(0)
    k1, k2, k3, k4 = jax.random.split(key, 4)
    # torch.nn.Linear weight is (out, in); stored pre-transposed as (in, out).
    w1 = jax.random.uniform(k1, (n_features, n_hidden), jnp.float32, -0.5, 0.5)
    b1 = jax.random.uniform(k2, (1, n_hidden), jnp.float32, -0.5, 0.5)
    w2 = jax.random.uniform(k3, (n_hidden, n_output), jnp.float32, -0.5, 0.5)
    b2 = jax.random.uniform(k4, (1, n_output), jnp.float32, -0.5, 0.5)

    out = net_forward(x, w1, b1, w2, b2)
    jax.block_until_ready(out)

    # Pure-JAX reference for correctness.
    ref = jnp.maximum(x @ w1 + b1, 0.0) @ w2 + b2
    assert out.shape == (5, n_output)
    assert jnp.allclose(out, ref, atol=1e-5), "mismatch vs reference"

    print("KERNEL_OK")
</pallas_src>

<mosaic_0001>
module attributes {stable_mosaic.version = 11 : i64} {
  func.func @mlp_kernel(%arg0: memref<8x128xf32, #tpu.memory_space<vmem>>, %arg1: memref<5x1xf32, #tpu.memory_space<vmem>>) attributes {dimension_semantics = [], scalar_prefetch = 0 : i64, scratch_operands = 0 : i64, tpu.core_type = #tpu.core_type<tc>} {
    %c0 = arith.constant 0 : index
    %c0_0 = arith.constant 0 : index
    %0 = vector.load %arg0[%c0, %c0_0] : memref<8x128xf32, #tpu.memory_space<vmem>>, vector<8x128xf32>
    %1 = vector.extract_strided_slice %0 {offsets = [0, 0], sizes = [1, 128], strides = [1, 1]} : vector<8x128xf32> to vector<1x128xf32>
    %2 = vector.extract_strided_slice %0 {offsets = [1, 0], sizes = [1, 128], strides = [1, 1]} : vector<8x128xf32> to vector<1x128xf32>
    %3 = vector.extract_strided_slice %0 {offsets = [2, 0], sizes = [1, 128], strides = [1, 1]} : vector<8x128xf32> to vector<1x128xf32>
    %4 = vector.extract_strided_slice %0 {offsets = [3, 0], sizes = [5, 1], strides = [1, 1]} : vector<8x128xf32> to vector<5x1xf32>
    %5 = vector.broadcast %4 : vector<5x1xf32> to vector<5x128xf32>
    %6 = vector.broadcast %1 : vector<1x128xf32> to vector<5x128xf32>
    %7 = arith.mulf %5, %6 : vector<5x128xf32>
    %8 = vector.broadcast %2 : vector<1x128xf32> to vector<5x128xf32>
    %9 = arith.addf %7, %8 : vector<5x128xf32>
    %cst = arith.constant 0.000000e+00 : f32
    %10 = vector.broadcast %cst : f32 to vector<5x128xf32>
    %11 = arith.maximumf %9, %10 : vector<5x128xf32>
    %12 = vector.broadcast %3 : vector<1x128xf32> to vector<5x128xf32>
    %13 = arith.mulf %11, %12 : vector<5x128xf32>
    %cst_1 = arith.constant dense<0.000000e+00> : vector<5xf32>
    %14 = vector.multi_reduction <add>, %13, %cst_1 [1] : vector<5x128xf32> to vector<5xf32>
    %15 = vector.shape_cast %14 : vector<5xf32> to vector<5x1xf32>
    %c0_2 = arith.constant 0 : index
    %c0_3 = arith.constant 0 : index
    %16 = vector.load %arg1[%c0_2, %c0_3] : memref<5x1xf32, #tpu.memory_space<vmem>>, vector<5x1xf32>
    tpu.vector_store %arg1[%c0_2, %c0_3], %15 {strides = array<i32>} : memref<5x1xf32, #tpu.memory_space<vmem>>, vector<5x1xf32>,
    return
  }
}

</mosaic_0001>

<bundles_post_ra>
// kernel: tpu_custom_call.1
= control target key start
LH: loop header
LB: loop body
LE: loop exit
PB: predicated region body
PF: predicated region fallthrough
CT: control target
= control target key end

     0   :  { %6 = vsyncpa [#allocation3], 0  ;;  %s78_s6 = smov [#allocation2]   ;;  %s96_s0 = inlined_call_operand.hbm [shape: f32[8,128], index: 0, kind: input, shape index: {}]   ;;  %s97_s1 = inlined_call_operand.vmem [shape: f32[5,1], index: 1, kind: output, shape index: {}]  }
   0x1   :  { %s13_s7 = sshll.u32 %s78_s6, 4  ;;  %s14_s7 = int_to_ptr.vmem [resolvable:$true] %s13_s7 }
   0x2   :  { %s64_s8 = scalar_lea.vmem %s14_s7, 128  ;;  %p69_p1 = scmp.lt.s32.totalorder %s14_s7, %s14_s7 }
   0x3   :  { %p65_p0 = scmp.ne.s32.totalorder %s14_s7, %s64_s8  ;;  %p70_p2 = scmp.lt.s32.totalorder %s64_s8, %s64_s8 }
   0x5   :  { %p71_p3 = por %p70_p2, %p69_p1 }
   0x7   :  { %p72_p4 = pnand %p71_p3, %p65_p0 }
   0x9   :  { %75 = shalt.err (!%p72_p4)
}
   0xa   :  { %16 = dma.hbm_to_vmem [thread:$0]  %s96_s0, 128, %s14_s7, [#allocation3]  }
   0xb   :  { %76 = dma.done.wait [#allocation3], 128  }
   0xc   :  { %77 = vsyncadd [#allocation3], 4294967168  ;;  %v79_v0 = vmov 0   ;;  %v20_v1 = vld [vmem:[#allocation2] sm:$0xff]  ;;  %v26_v2 = vlaneseq  ;;  %vm42_vm0 = vcmask 1047555   ;;  %vm46_vm1 = vcmask 7171  }
   0xd   :  { %55 = vset.pattern.permute.xlu0 %v79_v0 }
   0xe   :  { %23 = vperm.xlu0 %55, %v20_v1   ;;  %v27_v3 = vshrl.u32 %v26_v2, 7 }
  0x10   :  { %v28_v4 = vsub.s32 0, %v27_v3  ;;  %v33_v5 = vsub.s32 1, %v27_v3  ;;  %v39_v8 = vsub.s32 2, %v27_v3 }
  0x12   :  { %v29_v6 = vrot.slane %v20_v1, %v28_v4  ;;  %v34_v7 = vrot.slane %v20_v1, %v33_v5  ;;  %v40_v12 = vrot.slane %v20_v1, %v39_v8 }
  0x89   :  { %v24_v9 = vpop.permute.xlu0 %23 }
  0x8a   :  { %v30_v10 = vmul.f32 %v29_v6, %v24_v9 }
  0x8c   :  { %v35_v11 = vadd.f32 %v34_v7, %v30_v10 }
  0x8e   :  { %v36_v13 = vmax.f32 %v35_v11, 0.0 }
  0x90   :  { %v41_v14 = vmul.f32 %v40_v12, %v36_v13 }
  0x92   :  { %v43_v15 = vsel %vm42_vm0, %v41_v14, 0.0 }
  0x93   :  { %44 = vadd.xlane.f32.xlu0 %v43_v15 }
 0x11c   :  { %v45_v16 = vpop.xlane.xlu0 %44 }
 0x11d   :  { %47 = vst.msk [vmem:[%s97_s1 - $0x3] sm:$0xf8] %vm46_vm1, %v45_v16 }
 0x11e   :  { %52 = vsyncpa [#allocation3], 1 }

</bundles_post_ra>
